<compile_context>
chip_gen: v5e
topology: v5e:2x2
jax: 0.10.0
libtpu: 0.0.40
codegen_flags: <defaults>
</compile_context>

<pallas_src>
import functools

import jax
import jax.numpy as jnp
from jax import lax
from jax.experimental import pallas as pl
from jax.experimental.pallas import tpu as pltpu


# ----------------------------------------------------------------------------
# Fused Pallas kernel: predictor Linear + all-k contrastive scores +
# log-softmax + diag-sum (loss) + flat-argmax correct count.
# ----------------------------------------------------------------------------
def _cpc_head_kernel(ctx_ref, w_ref, b_ref, lat_ref, out_ref, *,
                     n_batches, n_timesteps_out):
    B = n_batches
    K = n_timesteps_out

    # (1) predictor Linear (shared for all k), computed once.  bf16 x bf16
    #     on the MXU, f32 accumulate, bias folded in f32.
    pred = jnp.dot(ctx_ref[...], w_ref[...],
                   preferred_element_type=jnp.float32)            # (B, C)
    pred = pred + b_ref[...]                                       # (1, C) bcast

    # (2) all future timesteps in ONE matmul:
    #     scores[k*B+i, j] = <latent_k_i, pred_j>, contracting the lane-dense
    #     C axis on the MXU (no pred.T materialization).
    scores = lax.dot_general(lat_ref[...], pred.astype(lat_ref.dtype),
                             (((1,), (1,)), ((), ())),
                             preferred_element_type=jnp.float32)   # (K*B, B)

    # (3) row-wise LogSoftmax(dim=1), numerically stable, kept in f32.
    m = jnp.max(scores, axis=1, keepdims=True)
    s = scores - m
    lsm = s - jnp.log(jnp.sum(jnp.exp(s), axis=1, keepdims=True))  # (K*B, B)

    # (4) fused consumers.  K is small and static -> unrolled Python loop.
    fr = lax.broadcasted_iota(jnp.int32, (B, B), 0)
    fc = lax.broadcasted_iota(jnp.int32, (B, B), 1)
    eye = fr == fc
    flat_idx = fr * B + fc                                         # row-major

    diag_total = jnp.float32(0.0)
    correct = jnp.float32(0.0)
    for k in range(K):
        blk = lsm[k * B:(k + 1) * B, :]                            # (B, B)
        diag_total = diag_total + jnp.sum(jnp.where(eye, blk, 0.0))
        gmax = jnp.max(blk)
        first = jnp.min(jnp.where(blk == gmax, flat_idx, B * B))   # flat argmax
        # torch: sum(argmax(lsm_k) == arange(B)) == 1 iff the (flat,
        # first-occurrence) argmax index lies in [0, B).
        correct = correct + (first < B).astype(jnp.float32)

    # (5) lane-dense (1, 128) output row: lane0 = diag sum, lane1 = correct.
    lane = lax.broadcasted_iota(jnp.int32, (1, 128), 1)
    out_ref[...] = jnp.where(lane == 0, diag_total,
                             jnp.where(lane == 1, correct, 0.0)).astype(
                                 jnp.float32)


def cpc_contrastive_head(context, latents_out, pred_w, pred_b):
    """context: (B, E) f32; latents_out: (K, B, C) f32;
    pred_w: (E, C) f32 (pre-transposed nn.Linear weight); pred_b: (C,) f32.
    Returns (diag_sum_total, correct_count) as f32 scalars."""
    B, E = context.shape
    K, _, C = latents_out.shape

    ctx_bf = context.astype(jnp.bfloat16)
    w_bf = pred_w.astype(jnp.bfloat16)
    lat_bf = latents_out.reshape(K * B, C).astype(jnp.bfloat16)
    b2 = pred_b.reshape(1, C).astype(jnp.float32)

    kernel = functools.partial(_cpc_head_kernel, n_batches=B,
                               n_timesteps_out=K)
    cost = pl.CostEstimate(
        flops=2 * B * E * C + 2 * (K * B) * B * C,
        transcendentals=K * B * B,
        bytes_accessed=2 * (B * E + E * C + K * B * C) + 4 * (C + 128))

    out = pl.pallas_call(
        kernel,
        out_shape=jax.ShapeDtypeStruct((1, 128), jnp.float32),
        grid_spec=pl.GridSpec(
            grid=(1,),
            in_specs=[
                pl.BlockSpec((B, E), lambda i: (0, 0)),        # context
                pl.BlockSpec((E, C), lambda i: (0, 0)),        # shared W^T
                pl.BlockSpec((1, C), lambda i: (0, 0)),        # shared bias
                pl.BlockSpec((K * B, C), lambda i: (0, 0)),    # all latents
            ],
            out_specs=pl.BlockSpec((1, 128), lambda i: (0, 0)),
        ),
        compiler_params=pltpu.CompilerParams(
            dimension_semantics=("arbitrary",)),
        cost_estimate=cost,
    )(ctx_bf, w_bf, b2, lat_bf)
    return out[0, 0], out[0, 1]


# ----------------------------------------------------------------------------
# Stand-ins for the constructor-injected sub-modules (plain JAX)
# ----------------------------------------------------------------------------
def encode_all(xw, enc_w, enc_b):
    # TODO(synk): encoder_model is an external nn.Module passed to CPC's
    # constructor; a flatten + Linear stand-in is used, batched over all
    # windows in one matmul.
    W, B = xw.shape[0], xw.shape[1]
    flat = xw.reshape(W * B, -1)
    return (flat @ enc_w + enc_b).reshape(W, B, -1)                # (W, B, C)


def autoregress(latents, hidden, ar_wi, ar_wh, ar_b):
    # TODO(synk): autoregressive_model is an external nn.Module (GRU in the
    # original project); a tanh-RNN stand-in is used here.
    def step(h, lat_t):
        h = jnp.tanh(lat_t @ ar_wi + h @ ar_wh + ar_b)
        return h, h
    hidden, outs = lax.scan(step, hidden, latents)
    return outs, hidden                                            # (T,B,E),(B,E)


# ----------------------------------------------------------------------------
# CPC.forward
# ----------------------------------------------------------------------------
def cpc_forward(x_windows, n_timesteps_in, n_timesteps_out, hidden, params):
    # x_windows: (B, W, L, F) -> (W, B, L, F)  (matches .permute(1,0,2,3))
    xw = jnp.transpose(x_windows, (1, 0, 2, 3))
    n_windows, n_batches = xw.shape[0], xw.shape[1]
    assert n_windows == n_timesteps_in + n_timesteps_out

    lat_all = encode_all(xw, params["enc_w"], params["enc_b"])     # (W, B, C)
    latents_in = lat_all[:n_timesteps_in]                          # (Tin,B,C)
    latents_out = lat_all[n_windows - n_timesteps_out:]            # (K, B, C)

    ctx_seq, hidden = autoregress(latents_in, hidden, params["ar_wi"],
                                  params["ar_wh"], params["ar_b"])
    context = ctx_seq[-1]                                          # (B, E)

    # TODO(synk): predictor_model is constructor-injected; modeled as one
    # shared Linear(E -> C) applied for every k (the k argument is ignored).
    diag_sum, correct = cpc_contrastive_head(
        context, latents_out, params["pred_w"], params["pred_b"])

    loss = diag_sum / (n_batches * -1.0)
    accuracy = correct / (n_batches * n_timesteps_out)
    return accuracy, loss, hidden


# ----------------------------------------------------------------------------
# Parameter init (predictor matches nn.Linear + kaiming_normal_(fan_out, relu))
# ----------------------------------------------------------------------------
def init_params(key, win_len, feat, code_size, encoding_size):
    ks = jax.random.split(key, 5)
    d_in = win_len * feat
    enc_w = jax.random.normal(ks[0], (d_in, code_size), jnp.float32) / jnp.sqrt(
        jnp.float32(d_in))
    enc_b = jnp.zeros((code_size,), jnp.float32)
    ar_wi = jax.random.normal(ks[1], (code_size, encoding_size),
                              jnp.float32) / jnp.sqrt(jnp.float32(code_size))
    ar_wh = jax.random.normal(ks[2], (encoding_size, encoding_size),
                              jnp.float32) / jnp.sqrt(jnp.float32(encoding_size))
    ar_b = jnp.zeros((encoding_size,), jnp.float32)
    std = (2.0 / code_size) ** 0.5                     # kaiming fan_out, relu
    pw = jax.random.normal(ks[3], (code_size, encoding_size), jnp.float32) * std
    bound = 1.0 / (encoding_size ** 0.5)
    pb = jax.random.uniform(ks[4], (code_size,), jnp.float32, -bound, bound)
    return dict(enc_w=enc_w, enc_b=enc_b, ar_wi=ar_wi, ar_wh=ar_wh, ar_b=ar_b,
                pred_w=pw.T, pred_b=pb)                # store W^T as (E, C)


if __name__ == "__main__":
    B = 8
    timesteps_in = 4
    timesteps_out = 4
    win_len, feat = 16, 8          # window flattens to 128
    code_size = 128                # C (lane-dense)
    encoding_size = 128            # E (lane-dense)

    key = jax.random.PRNGKey(0)
    kx, kp = jax.random.split(key)
    x_windows = jax.random.normal(
        kx, (B, timesteps_in + timesteps_out, win_len, feat), jnp.float32)
    params = init_params(kp, win_len, feat, code_size, encoding_size)
    hidden0 = jnp.zeros((B, encoding_size), jnp.float32)

    accuracy, loss, hidden_out = cpc_forward(
        x_windows, timesteps_in, timesteps_out, hidden0, params)
    accuracy, loss, hidden_out = jax.block_until_ready(
        (accuracy, loss, hidden_out))

    # ---------------- pure-JAX reference (same bf16 matmul casts) -----------
    xw = jnp.transpose(x_windows, (1, 0, 2, 3))
    lat_all = encode_all(xw, params["enc_w"], params["enc_b"])
    ctx_seq, _ = autoregress(lat_all[:timesteps_in], hidden0, params["ar_wi"],
                             params["ar_wh"], params["ar_b"])
    ctx = ctx_seq[-1]
    lat_out = lat_all[timesteps_in:]

    ctx_bf = ctx.astype(jnp.bfloat16)
    w_bf = params["pred_w"].astype(jnp.bfloat16)
    lat_bf = lat_out.reshape(timesteps_out * B, code_size).astype(jnp.bfloat16)
    pred_ref = jnp.dot(ctx_bf, w_bf,
                       preferred_element_type=jnp.float32) + params["pred_b"]
    scores_ref = lax.dot_general(lat_bf, pred_ref.astype(jnp.bfloat16),
                                 (((1,), (1,)), ((), ())),
                                 preferred_element_type=jnp.float32)
    lsm_ref = jax.nn.log_softmax(
        scores_ref.reshape(timesteps_out, B, B), axis=-1)

    loss_ref = jnp.sum(jnp.diagonal(lsm_ref, axis1=1, axis2=2)) / (B * -1.0)
    flat_arg = jnp.argmax(lsm_ref.reshape(timesteps_out, -1), axis=1)
    correct_ref = jnp.sum(flat_arg[:, None] == jnp.arange(B)[None, :])
    acc_ref = correct_ref / (B * timesteps_out)

    assert jnp.allclose(loss, loss_ref, atol=1e-2, rtol=1e-2), (loss, loss_ref)
    assert jnp.allclose(accuracy, acc_ref, atol=1e-6), (accuracy, acc_ref)
    print("KERNEL_OK")
</pallas_src>

<mosaic_0001>
module attributes {stable_mosaic.version = 11 : i64} {
  func.func @_cpc_head_kernel(%arg0: i32, %arg1: memref<8x128xbf16, #tpu.memory_space<vmem>>, %arg2: memref<128x128xbf16, #tpu.memory_space<vmem>>, %arg3: memref<1x128xf32, #tpu.memory_space<vmem>>, %arg4: memref<32x128xbf16, #tpu.memory_space<vmem>>, %arg5: memref<1x128xf32, #tpu.memory_space<vmem>>) attributes {dimension_semantics = [#tpu.dimension_semantics<arbitrary>], iteration_bounds = array<i64: 1>, scalar_prefetch = 0 : i64, scratch_operands = 0 : i64, tpu.core_type = #tpu.core_type<tc>, window_params = [{pipeline_mode = #tpu.pipeline_mode<synchronous>, transform_indices = @transform_0, window_bounds = array<i64: 8, 128>}, {pipeline_mode = #tpu.pipeline_mode<synchronous>, transform_indices = @transform_1, window_bounds = array<i64: 128, 128>}, {pipeline_mode = #tpu.pipeline_mode<synchronous>, transform_indices = @transform_2, window_bounds = array<i64: 1, 128>}, {pipeline_mode = #tpu.pipeline_mode<synchronous>, transform_indices = @transform_3, window_bounds = array<i64: 32, 128>}, {pipeline_mode = #tpu.pipeline_mode<synchronous>, transform_indices = @transform_4, window_bounds = array<i64: 1, 128>}]} {
    %c0 = arith.constant 0 : index
    %c0_0 = arith.constant 0 : index
    %0 = vector.load %arg1[%c0, %c0_0] : memref<8x128xbf16, #tpu.memory_space<vmem>>, vector<8x128xbf16>
    %c0_1 = arith.constant 0 : index
    %c0_2 = arith.constant 0 : index
    %1 = vector.load %arg2[%c0_1, %c0_2] : memref<128x128xbf16, #tpu.memory_space<vmem>>, vector<128x128xbf16>
    %cst = arith.constant dense<0.000000e+00> : vector<8x128xf32>
    %2 = tpu.matmul %0, %1, %cst {dimension_numbers = #tpu.dot_dimension_numbers<[1], [0], [0], [1], [0, 0, 1, 1], [], []>} : vector<8x128xbf16>, vector<128x128xbf16>, vector<8x128xf32> -> vector<8x128xf32>
    %c0_3 = arith.constant 0 : index
    %c0_4 = arith.constant 0 : index
    %3 = vector.load %arg3[%c0_3, %c0_4] : memref<1x128xf32, #tpu.memory_space<vmem>>, vector<1x128xf32>
    %4 = vector.broadcast %3 : vector<1x128xf32> to vector<8x128xf32>
    %5 = arith.addf %2, %4 : vector<8x128xf32>
    %c0_5 = arith.constant 0 : index
    %c0_6 = arith.constant 0 : index
    %6 = vector.load %arg4[%c0_5, %c0_6] : memref<32x128xbf16, #tpu.memory_space<vmem>>, vector<32x128xbf16>
    %7 = arith.truncf %5 : vector<8x128xf32> to vector<8x128xbf16>
    %cst_7 = arith.constant dense<0.000000e+00> : vector<32x8xf32>
    %8 = tpu.matmul %6, %7, %cst_7 {dimension_numbers = #tpu.dot_dimension_numbers<[1], [1], [0], [0], [0, 0, 1, 0], [], []>} : vector<32x128xbf16>, vector<8x128xbf16>, vector<32x8xf32> -> vector<32x8xf32>
    %cst_8 = arith.constant dense<0xFF800000> : vector<32xf32>
    %9 = vector.multi_reduction <maximumf>, %8, %cst_8 [1] : vector<32x8xf32> to vector<32xf32>
    %10 = vector.shape_cast %9 : vector<32xf32> to vector<32x1xf32>
    %11 = vector.broadcast %10 : vector<32x1xf32> to vector<32x8xf32>
    %12 = arith.subf %8, %11 : vector<32x8xf32>
    %13 = math.exp %12 : vector<32x8xf32>
    %cst_9 = arith.constant dense<0.000000e+00> : vector<32xf32>
    %14 = vector.multi_reduction <add>, %13, %cst_9 [1] : vector<32x8xf32> to vector<32xf32>
    %15 = vector.shape_cast %14 : vector<32xf32> to vector<32x1xf32>
    %16 = math.log %15 : vector<32x1xf32>
    %17 = vector.broadcast %16 : vector<32x1xf32> to vector<32x8xf32>
    %18 = arith.subf %12, %17 : vector<32x8xf32>
    %19 = tpu.iota {dimensions = array<i32: 0>} : vector<8x8xi32>
    %20 = tpu.iota {dimensions = array<i32: 1>} : vector<8x8xi32>
    %21 = arith.cmpi eq, %19, %20 : vector<8x8xi32>
    %c8_i32 = arith.constant 8 : i32
    %22 = vector.broadcast %c8_i32 : i32 to vector<8x8xi32>
    %23 = arith.muli %19, %22 : vector<8x8xi32>
    %24 = arith.addi %23, %20 : vector<8x8xi32>
    %25 = vector.extract_strided_slice %18 {offsets = [0, 0], sizes = [8, 8], strides = [1, 1]} : vector<32x8xf32> to vector<8x8xf32>
    %cst_10 = arith.constant 0.000000e+00 : f32
    %26 = vector.broadcast %cst_10 : f32 to vector<8x8xf32>
    %27 = arith.select %21, %25, %26 : vector<8x8xi1>, vector<8x8xf32>
    %28 = vector.shape_cast %27 : vector<8x8xf32> to vector<1x8x8xf32>
    %cst_11 = arith.constant dense<0.000000e+00> : vector<1xf32>
    %29 = vector.multi_reduction <add>, %28, %cst_11 [1, 2] : vector<1x8x8xf32> to vector<1xf32>
    %30 = vector.shape_cast %29 : vector<1xf32> to vector<1x1x1xf32>
    %31 = vector.extract %30[0, 0, 0] : f32 from vector<1x1x1xf32>
    %cst_12 = arith.constant 0.000000e+00 : f32
    %32 = arith.addf %cst_12, %31 : f32
    %33 = vector.shape_cast %25 : vector<8x8xf32> to vector<1x8x8xf32>
    %cst_13 = arith.constant dense<0xFF800000> : vector<1xf32>
    %34 = vector.multi_reduction <maximumf>, %33, %cst_13 [1, 2] : vector<1x8x8xf32> to vector<1xf32>
    %35 = vector.shape_cast %34 : vector<1xf32> to vector<1x1x1xf32>
    %36 = vector.extract %35[0, 0, 0] : f32 from vector<1x1x1xf32>
    %37 = vector.broadcast %36 : f32 to vector<8x8xf32>
    %38 = arith.cmpf oeq, %25, %37 : vector<8x8xf32>
    %c64_i32 = arith.constant 64 : i32
    %39 = vector.broadcast %c64_i32 : i32 to vector<8x8xi32>
    %40 = arith.select %38, %24, %39 : vector<8x8xi1>, vector<8x8xi32>
    %41 = vector.shape_cast %40 : vector<8x8xi32> to vector<1x8x8xi32>
    %cst_14 = arith.constant dense<2147483647> : vector<1xi32>
    %42 = vector.multi_reduction <minsi>, %41, %cst_14 [1, 2] : vector<1x8x8xi32> to vector<1xi32>
    %43 = vector.shape_cast %42 : vector<1xi32> to vector<1x1x1xi32>
    %44 = vector.extract %43[0, 0, 0] : i32 from vector<1x1x1xi32>
    %c8_i32_15 = arith.constant 8 : i32
    %45 = arith.cmpi slt, %44, %c8_i32_15 : i32
    %46 = arith.extui %45 : i1 to i32
    %47 = arith.sitofp %46 : i32 to f32
    %cst_16 = arith.constant 0.000000e+00 : f32
    %48 = arith.addf %cst_16, %47 : f32
    %49 = vector.extract_strided_slice %18 {offsets = [8, 0], sizes = [8, 8], strides = [1, 1]} : vector<32x8xf32> to vector<8x8xf32>
    %cst_17 = arith.constant 0.000000e+00 : f32
    %50 = vector.broadcast %cst_17 : f32 to vector<8x8xf32>
    %51 = arith.select %21, %49, %50 : vector<8x8xi1>, vector<8x8xf32>
    %52 = vector.shape_cast %51 : vector<8x8xf32> to vector<1x8x8xf32>
    %cst_18 = arith.constant dense<0.000000e+00> : vector<1xf32>
    %53 = vector.multi_reduction <add>, %52, %cst_18 [1, 2] : vector<1x8x8xf32> to vector<1xf32>
    %54 = vector.shape_cast %53 : vector<1xf32> to vector<1x1x1xf32>
    %55 = vector.extract %54[0, 0, 0] : f32 from vector<1x1x1xf32>
    %56 = arith.addf %32, %55 : f32
    %57 = vector.shape_cast %49 : vector<8x8xf32> to vector<1x8x8xf32>
    %cst_19 = arith.constant dense<0xFF800000> : vector<1xf32>
    %58 = vector.multi_reduction <maximumf>, %57, %cst_19 [1, 2] : vector<1x8x8xf32> to vector<1xf32>
    %59 = vector.shape_cast %58 : vector<1xf32> to vector<1x1x1xf32>
    %60 = vector.extract %59[0, 0, 0] : f32 from vector<1x1x1xf32>
    %61 = vector.broadcast %60 : f32 to vector<8x8xf32>
    %62 = arith.cmpf oeq, %49, %61 : vector<8x8xf32>
    %c64_i32_20 = arith.constant 64 : i32
    %63 = vector.broadcast %c64_i32_20 : i32 to vector<8x8xi32>
    %64 = arith.select %62, %24, %63 : vector<8x8xi1>, vector<8x8xi32>
    %65 = vector.shape_cast %64 : vector<8x8xi32> to vector<1x8x8xi32>
    %cst_21 = arith.constant dense<2147483647> : vector<1xi32>
    %66 = vector.multi_reduction <minsi>, %65, %cst_21 [1, 2] : vector<1x8x8xi32> to vector<1xi32>
    %67 = vector.shape_cast %66 : vector<1xi32> to vector<1x1x1xi32>
    %68 = vector.extract %67[0, 0, 0] : i32 from vector<1x1x1xi32>
    %c8_i32_22 = arith.constant 8 : i32
    %69 = arith.cmpi slt, %68, %c8_i32_22 : i32
    %70 = arith.extui %69 : i1 to i32
    %71 = arith.sitofp %70 : i32 to f32
    %72 = arith.addf %48, %71 : f32
    %73 = vector.extract_strided_slice %18 {offsets = [16, 0], sizes = [8, 8], strides = [1, 1]} : vector<32x8xf32> to vector<8x8xf32>
    %cst_23 = arith.constant 0.000000e+00 : f32
    %74 = vector.broadcast %cst_23 : f32 to vector<8x8xf32>
    %75 = arith.select %21, %73, %74 : vector<8x8xi1>, vector<8x8xf32>
    %76 = vector.shape_cast %75 : vector<8x8xf32> to vector<1x8x8xf32>
    %cst_24 = arith.constant dense<0.000000e+00> : vector<1xf32>
    %77 = vector.multi_reduction <add>, %76, %cst_24 [1, 2] : vector<1x8x8xf32> to vector<1xf32>
    %78 = vector.shape_cast %77 : vector<1xf32> to vector<1x1x1xf32>
    %79 = vector.extract %78[0, 0, 0] : f32 from vector<1x1x1xf32>
    %80 = arith.addf %56, %79 : f32
    %81 = vector.shape_cast %73 : vector<8x8xf32> to vector<1x8x8xf32>
    %cst_25 = arith.constant dense<0xFF800000> : vector<1xf32>
    %82 = vector.multi_reduction <maximumf>, %81, %cst_25 [1, 2] : vector<1x8x8xf32> to vector<1xf32>
    %83 = vector.shape_cast %82 : vector<1xf32> to vector<1x1x1xf32>
    %84 = vector.extract %83[0, 0, 0] : f32 from vector<1x1x1xf32>
    %85 = vector.broadcast %84 : f32 to vector<8x8xf32>
    %86 = arith.cmpf oeq, %73, %85 : vector<8x8xf32>
    %c64_i32_26 = arith.constant 64 : i32
    %87 = vector.broadcast %c64_i32_26 : i32 to vector<8x8xi32>
    %88 = arith.select %86, %24, %87 : vector<8x8xi1>, vector<8x8xi32>
    %89 = vector.shape_cast %88 : vector<8x8xi32> to vector<1x8x8xi32>
    %cst_27 = arith.constant dense<2147483647> : vector<1xi32>
    %90 = vector.multi_reduction <minsi>, %89, %cst_27 [1, 2] : vector<1x8x8xi32> to vector<1xi32>
    %91 = vector.shape_cast %90 : vector<1xi32> to vector<1x1x1xi32>
    %92 = vector.extract %91[0, 0, 0] : i32 from vector<1x1x1xi32>
    %c8_i32_28 = arith.constant 8 : i32
    %93 = arith.cmpi slt, %92, %c8_i32_28 : i32
    %94 = arith.extui %93 : i1 to i32
    %95 = arith.sitofp %94 : i32 to f32
    %96 = arith.addf %72, %95 : f32
    %97 = vector.extract_strided_slice %18 {offsets = [24, 0], sizes = [8, 8], strides = [1, 1]} : vector<32x8xf32> to vector<8x8xf32>
    %cst_29 = arith.constant 0.000000e+00 : f32
    %98 = vector.broadcast %cst_29 : f32 to vector<8x8xf32>
    %99 = arith.select %21, %97, %98 : vector<8x8xi1>, vector<8x8xf32>
    %100 = vector.shape_cast %99 : vector<8x8xf32> to vector<1x8x8xf32>
    %cst_30 = arith.constant dense<0.000000e+00> : vector<1xf32>
    %101 = vector.multi_reduction <add>, %100, %cst_30 [1, 2] : vector<1x8x8xf32> to vector<1xf32>
    %102 = vector.shape_cast %101 : vector<1xf32> to vector<1x1x1xf32>
    %103 = vector.extract %102[0, 0, 0] : f32 from vector<1x1x1xf32>
    %104 = arith.addf %80, %103 : f32
    %105 = vector.shape_cast %97 : vector<8x8xf32> to vector<1x8x8xf32>
    %cst_31 = arith.constant dense<0xFF800000> : vector<1xf32>
    %106 = vector.multi_reduction <maximumf>, %105, %cst_31 [1, 2] : vector<1x8x8xf32> to vector<1xf32>
    %107 = vector.shape_cast %106 : vector<1xf32> to vector<1x1x1xf32>
    %108 = vector.extract %107[0, 0, 0] : f32 from vector<1x1x1xf32>
    %109 = vector.broadcast %108 : f32 to vector<8x8xf32>
    %110 = arith.cmpf oeq, %97, %109 : vector<8x8xf32>
    %c64_i32_32 = arith.constant 64 : i32
    %111 = vector.broadcast %c64_i32_32 : i32 to vector<8x8xi32>
    %112 = arith.select %110, %24, %111 : vector<8x8xi1>, vector<8x8xi32>
    %113 = vector.shape_cast %112 : vector<8x8xi32> to vector<1x8x8xi32>
    %cst_33 = arith.constant dense<2147483647> : vector<1xi32>
    %114 = vector.multi_reduction <minsi>, %113, %cst_33 [1, 2] : vector<1x8x8xi32> to vector<1xi32>
    %115 = vector.shape_cast %114 : vector<1xi32> to vector<1x1x1xi32>
    %116 = vector.extract %115[0, 0, 0] : i32 from vector<1x1x1xi32>
    %c8_i32_34 = arith.constant 8 : i32
    %117 = arith.cmpi slt, %116, %c8_i32_34 : i32
    %118 = arith.extui %117 : i1 to i32
    %119 = arith.sitofp %118 : i32 to f32
    %120 = arith.addf %96, %119 : f32
    %121 = tpu.iota {dimensions = array<i32: 1>} : vector<1x128xi32>
    %c0_i32 = arith.constant 0 : i32
    %122 = vector.broadcast %c0_i32 : i32 to vector<1x128xi32>
    %123 = arith.cmpi eq, %121, %122 : vector<1x128xi32>
    %c1_i32 = arith.constant 1 : i32
    %124 = vector.broadcast %c1_i32 : i32 to vector<1x128xi32>
    %125 = arith.cmpi eq, %121, %124 : vector<1x128xi32>
    %cst_35 = arith.constant 0.000000e+00 : f32
    %126 = vector.broadcast %120 : f32 to vector<1x128xf32>
    %127 = vector.broadcast %cst_35 : f32 to vector<1x128xf32>
    %128 = arith.select %125, %126, %127 : vector<1x128xi1>, vector<1x128xf32>
    %129 = vector.broadcast %104 : f32 to vector<1x128xf32>
    %130 = arith.select %123, %129, %128 : vector<1x128xi1>, vector<1x128xf32>
    %c0_36 = arith.constant 0 : index
    %c0_37 = arith.constant 0 : index
    %131 = vector.load %arg5[%c0_36, %c0_37] : memref<1x128xf32, #tpu.memory_space<vmem>>, vector<1x128xf32>
    tpu.vector_store %arg5[%c0_36, %c0_37], %130 {strides = array<i32>} : memref<1x128xf32, #tpu.memory_space<vmem>>, vector<1x128xf32>,
    return
  }
  func.func @transform_0(%arg0: i32) -> (i32, i32) {
    %c0_i32 = arith.constant 0 : i32
    %c0_i32_0 = arith.constant 0 : i32
    %c0_i32_1 = arith.constant 0 : i32
    return %c0_i32, %c0_i32_0 : i32, i32
  }
  func.func @transform_1(%arg0: i32) -> (i32, i32) {
    %c0_i32 = arith.constant 0 : i32
    %c0_i32_0 = arith.constant 0 : i32
    %c0_i32_1 = arith.constant 0 : i32
    return %c0_i32, %c0_i32_0 : i32, i32
  }
  func.func @transform_2(%arg0: i32) -> (i32, i32) {
    %c0_i32 = arith.constant 0 : i32
    %c0_i32_0 = arith.constant 0 : i32
    %c0_i32_1 = arith.constant 0 : i32
    return %c0_i32, %c0_i32_0 : i32, i32
  }
  func.func @transform_3(%arg0: i32) -> (i32, i32) {
    %c0_i32 = arith.constant 0 : i32
    %c0_i32_0 = arith.constant 0 : i32
    %c0_i32_1 = arith.constant 0 : i32
    return %c0_i32, %c0_i32_0 : i32, i32
  }
  func.func @transform_4(%arg0: i32) -> (i32, i32) {
    %c0_i32 = arith.constant 0 : i32
    %c0_i32_0 = arith.constant 0 : i32
    %c0_i32_1 = arith.constant 0 : i32
    return %c0_i32, %c0_i32_0 : i32, i32
  }
}

</mosaic_0001>

<bundles_post_ra>
// kernel: tpu_custom_call.1
= control target key start
LH: loop header
LB: loop body
LE: loop exit
PB: predicated region body
PF: predicated region fallthrough
CT: control target
= control target key end

     0   :  { %9 = vsyncpa [#allocation3], 0  ;;  %s806_s0 = inlined_call_operand.hbm [shape: bf16[8,128], index: 0, kind: input, shape index: {}]   ;;  %s807_s1 = inlined_call_operand.hbm [shape: bf16[128,128], index: 1, kind: input, shape index: {}]   ;;  %s808_s2 = inlined_call_operand.vmem [shape: f32[1,128], index: 2, kind: input, shape index: {}]   ;;  %s809_s3 = inlined_call_operand.hbm [shape: bf16[32,128], index: 3, kind: input, shape index: {}]   ;;  %s810_s4 = inlined_call_operand.hbm [shape: f32[1,128], index: 4, kind: output, shape index: {}]  }
   0x1   :  { %10 = vsyncpa [#allocation6], 0  ;;  %s27_s17 = sshll.u32 %s807_s1, 4  ;;  %s28_s17 = int_to_ptr.hbm [resolvable:$true] %s27_s17 }
   0x2   :  { %11 = vsyncpa [#allocation4], 0  ;;  %s678_s18 = smov [#allocation5]   ;;  %s17_s22 = sshll.u32 %s806_s0, 4  ;;  %s18_s22 = int_to_ptr.hbm [resolvable:$true] %s17_s22 }
   0x3   :  { %s29_s19 = sshll.u32 %s678_s18, 4  ;;  %s679_s23 = smov 64   ;;  %s30_s19 = int_to_ptr.vmem [resolvable:$true] %s29_s19 }
   0x4   :  { %s680_s24 = smov 4   ;;  %s681_s25 = smov [#allocation2]  }
   0x5   :  { %35 = dma.hbm_to_vmem [thread:$0]  %s28_s17, 1024, %s30_s19, [#allocation6], %s679_s23, %s679_s23, %s680_s24  }
   0x6   :  { %s19_s26 = sshll.u32 %s681_s25, 4  ;;  %s42_s29 = sshll.u32 %s809_s3, 4  ;;  %s20_s26 = int_to_ptr.vmem [resolvable:$true] %s19_s26  ;;  %s43_s29 = int_to_ptr.hbm [resolvable:$true] %s42_s29 }
   0x7   :  { %22 = dma.hbm_to_vmem [thread:$0]  %s18_s22, 64, %s20_s26, [#allocation3]  }
   0x8   :  { %s682_s1 = smov [#allocation7]  }
   0x9   :  { %s44_s30 = sshll.u32 %s682_s1, 4  ;;  %s45_s30 = int_to_ptr.vmem [resolvable:$true] %s44_s30 }
   0xa   :  { %50 = dma.hbm_to_vmem [thread:$0]  %s43_s29, 256, %s45_s30, [#allocation6], %s679_s23, %s679_s23, %s680_s24  }
   0xb   :  { %672 = dma.done.wait [#allocation3], 64  }
   0xc   :  { %673 = vsyncadd [#allocation3], 4294967232 }
   0xd   :  { %674 = dma.done.wait [#allocation6], 1280  }
   0xe   :  { %675 = vsyncadd [#allocation6], 4294966016  ;;  %v526_v0 = vld [vmem:[#allocation5 + $0x38] sm:$0xff]  ;;  %v525_v1 = vld [vmem:[#allocation5 + $0x30] sm:$0xff]  ;;  %vm182_vm0 = vcmask 64512   ;;  %v231_v30 = vlaneseq  ;;  %s683_s29 = smov [#allocation8]  }
   0xf   :  { %133 = vmatpush.bf16.msra.mxu0 %v526_v0  ;;  %v524_v2 = vld [vmem:[#allocation5 + $0x28] sm:$0xff]  ;;  %v523_v3 = vld [vmem:[#allocation5 + $0x20] sm:$0xff]  ;;  %v522_v4 = vld [vmem:[#allocation5 + $0x18] sm:$0xff]  ;;  %s466_s1 = sshll.u32 %s683_s29, 4  ;;  %s467_s1 = int_to_ptr.vmem [resolvable:$true] %s466_s1 }
  0x10   :  { %v521_v5 = vld [vmem:[#allocation5 + $0x10] sm:$0xff]  ;;  %v520_v6 = vld [vmem:[#allocation5 + $0x8] sm:$0xff]  ;;  %v519_v7 = vld [vmem:[#allocation5] sm:$0xff]  ;;  %v725_v31 = vshrl.u32 %v231_v30, 7  ;;  %v727_v32 = vand.u32 127, %v231_v30 }
  0x11   :  { %v64_v8 = vld [vmem:[#allocation2] sm:$0xf]  ;;  %v527_v14 = vld [vmem:[#allocation7] sm:$0xff]  ;;  %v528_v59 = vld [vmem:[#allocation7 + $0x8] sm:$0xff] }
  0x12   :  { %v559_v9 = vld [vmem:[%s808_s2] ss:$0 sm:$0xff]  ;;  %vm235_vm1 = vcmp.eq.s32.totalorder %v725_v31, %v727_v32  ;;  %v236_v60 = vmul.u32 8, %v725_v31 }
  0x13   :  { %134 = vmatpush.bf16.msra.mxu0 %v525_v1 }
  0x14   :  { %v747_v61 = vadd.s32 %v236_v60, %v727_v32 }
  0x17   :  { %135 = vmatpush.bf16.msra.mxu0 %v524_v2 }
  0x1b   :  { %136 = vmatpush.bf16.msra.mxu0 %v523_v3 }
  0x1f   :  { %137 = vmatpush.bf16.msra.mxu0 %v522_v4 }
  0x23   :  { %138 = vmatpush.bf16.msra.mxu0 %v521_v5 }
  0x27   :  { %139 = vmatpush.bf16.msra.mxu0 %v520_v6 }
  0x2b   :  { %140 = vmatpush.bf16.msra.mxu0 %v519_v7 }
  0x2e   :  { %141 = vmatmul.bf16.vlgmr.msra.gmra.mxu0 %v64_v8 }
  0xab   :  { %v142_v10 = vpop.f32.mrf.mxu0 }
  0xac   :  { %v143_v11 = vadd.f32 %v559_v9, %v142_v10 }
  0xae   :  { %v150_v12 = vpack.c.bf16 %v143_v11, %v143_v11 }
  0xb0   :  { %170 = vmatpush.bf16.xpose.msra.mxu1 %v150_v12 }
  0xb3   :  { %v144_v13 = vpop.f32.mrf.mxu0 }
  0xb7   :  { %171 = vmatmul.bf16.vlgmr.msra.gmra.mxu1 %v527_v14 }
  0xc7   :  { %176 = vmatmul.bf16.gmra.mxu1 %v528_v59 }
 0x134   :  { %v172_v15 = vpop.f32.mrf.mxu1 }
 0x135   :  { %v183_v16 = vsel %vm182_vm0, %v172_v15, -inf }
 0x136   :  { %184 = vmax.xlane.f32.xlu0 %v183_v16 }
 0x13c   :  { %v174_v17 = vpop.f32.mrf.mxu1 }
 0x13d   :  { %v186_v18 = vsel %vm182_vm0, %v174_v17, -inf }
 0x13e   :  { %187 = vmax.xlane.f32.xlu2 %v186_v18 }
 0x144   :  { %v177_v8 = vpop.f32.mrf.mxu1 }
 0x145   :  { %v189_v9 = vsel %vm182_vm0, %v177_v8, -inf }
 0x1a9   :  { %v185_v19 = vpop.xlane.xlu0 %184 }
 0x1aa   :  { %v195_v20 = vsub.f32 %v172_v15, %v185_v19 }
 0x1ac   :  { %v199_v21 = vmul.f32 1.442695, %v195_v20 }
 0x1ae   :  { %560 = vpow2.f32 %v199_v21 }
 0x1b1   :  { %v188_v22 = vpop.xlane.xlu2 %187 }
 0x1b2   :  { %v196_v23 = vsub.f32 %v174_v17, %v188_v22 }
 0x1b4   :  { %v561_v24 = vpop.eup %560  ;;  %v201_v25 = vmul.f32 1.442695, %v196_v23 }
 0x1b5   :  { %v207_v26 = vsel %vm182_vm0, %v561_v24, 0.0 }
 0x1b6   :  { %562 = vpow2.f32 %v201_v25  ;;  %208 = vadd.xlane.f32.xlu0 %v207_v26 }
 0x1bc   :  { %v563_v27 = vpop.eup %562 }
 0x1bd   :  { %v210_v28 = vsel %vm182_vm0, %v563_v27, 0.0 }
 0x1be   :  { %211 = vadd.xlane.f32.xlu2 %v210_v28 }
 0x229   :  { %v209_v29 = vpop.xlane.xlu0 %208 }
 0x22a   :  { %564 = vlog2.f32 %v209_v29 }
 0x230   :  { %v565_v33 = vpop.eup %564 }
 0x231   :  { %v220_v34 = vmul.f32 0.6931472, %v565_v33  ;;  %v212_v35 = vpop.xlane.xlu2 %211 }
 0x232   :  { %566 = vlog2.f32 %v212_v35 }
 0x233   :  { %v227_v36 = vsub.f32 %v195_v20, %v220_v34 }
 0x235   :  { %v238_v37 = vsel %vm235_vm1, %v227_v36, 0.0  ;;  %v250_v43 = vsel %vm182_vm0, %v227_v36, -inf }
 0x236   :  { %v239_v38 = vsel %vm182_vm0, %v238_v37, 0.0 }
 0x237   :  { %240 = vadd.xlane.f32.xlu1 %v239_v38 }
 0x238   :  { %v567_v39 = vpop.eup %566 }
 0x239   :  { %v222_v40 = vmul.f32 0.6931472, %v567_v39 }
 0x23b   :  { %v735_v41 = vsub.f32 %v196_v23, %v222_v40 }
 0x23d   :  { %v292_v42 = vsel %vm235_vm1, %v735_v41, 0.0  ;;  %v304_v3 = vsel %vm182_vm0, %v735_v41, -inf }
 0x23e   :  { %v293_v44 = vsel %vm182_vm0, %v292_v42, 0.0 }
 0x23f   :  { %251 = vmax.xlane.f32.xlu1 %v250_v43  ;;  %294 = vadd.xlane.f32.xlu2 %v293_v44 }
 0x2aa   :  { %v241_v45 = vpop.xlane.xlu1 %240 }
 0x2ab   :  { %v242_v46 = vrot.slane %v241_v45, 4 }
 0x2ad   :  { %v243_v47 = vadd.f32 %v242_v46, %v241_v45 }
 0x2af   :  { %v244_v48 = vrot.slane %v243_v47, 2 }
 0x2b1   :  { %v245_v49 = vadd.f32 %v244_v48, %v243_v47 }
 0x2b2   :  { %v252_v50 = vpop.xlane.xlu1 %251  ;;  %v295_v10 = vpop.xlane.xlu2 %294 }
 0x2b3   :  { %v253_v51 = vrot.slane %v252_v50, 4  ;;  %v246_v52 = vrot.slane %v245_v49, 1  ;;  %v296_v12 = vrot.slane %v295_v10, 4 }
 0x2b5   :  { %v254_v53 = vmax.f32 %v252_v50, %v253_v51  ;;  %v247_v54 = vadd.f32 %v246_v52, %v245_v49  ;;  %v297_v15 = vadd.f32 %v296_v12, %v295_v10 }
 0x2b7   :  { %v255_v55 = vrot.slane %v254_v53, 2  ;;  %529 = vpush %v247_v54  ;;  %v298_v21 = vrot.slane %v297_v15, 2 }
 0x2b9   :  { %v256_v56 = vmax.f32 %v254_v53, %v255_v55  ;;  %v299_v26 = vadd.f32 %v298_v21, %v297_v15 }
 0x2bb   :  { %v257_v57 = vrot.slane %v256_v56, 1  ;;  %v300_v34 = vrot.slane %v299_v26, 1 }
 0x2bd   :  { %v258_v58 = vmax.f32 %v256_v56, %v257_v57  ;;  %v301_v38 = vadd.f32 %v300_v34, %v299_v26 }
 0x2bf   :  { %531 = vpush %v258_v58  ;;  %v179_v58 = vpop.f32.mrf.mxu1 }
 0x2c0   :  { %v192_v59 = vsel %vm182_vm0, %v179_v58, -inf }
 0x2e8   :  { %s744_s2 = spop %529 }
 0x2f0   :  { %s532_s5 = spop %531 }
 0x2f1   :  { %v260_v62 = vstv %s532_s5 }
 0x2f2   :  { %vm261_vm2 = vcmp.eq.f32.partialorder %v227_v36, %v260_v62 }
 0x2f3   :  { %v262_v63 = vsel %vm261_vm2, %v747_v61, 64 }
 0x2f4   :  { %v263_v0 = vsel %vm182_vm0, %v262_v63, 2147483647 }
 0x2f5   :  { %v265_v1 = vshra.s32 %v263_v0, 16  ;;  %v264_v4 = vand.u32 65535, %v263_v0 }
 0x2f7   :  { %v267_v2 = vcvt.s32.f32 %v265_v1  ;;  %v266_v6 = vcvt.s32.f32 %v264_v4 }
 0x2f9   :  { %268 = vmin.xlane.f32.xlu0 %v267_v2 }
 0x301   :  { %305 = vmax.xlane.f32.xlu0 %v304_v3 }
 0x36c   :  { %v269_v5 = vpop.xlane.xlu0 %268 }
 0x36d   :  { %vm270_vm3 = vcmp.eq.f32.partialorder %v267_v2, %v269_v5  ;;  %v275_v13 = vcvt.f32.s32 %v269_v5 }
 0x36e   :  { %v271_v7 = vsel %vm270_vm3, %v266_v6, inf }
 0x36f   :  { %272 = vmin.xlane.f32.xlu1 %v271_v7  ;;  %v276_v17 = vshll.u32 %v275_v13, 16 }
 0x374   :  { %v306_v11 = vpop.xlane.xlu0 %305 }
 0x375   :  { %v307_v14 = vrot.slane %v306_v11, 4 }
 0x377   :  { %190 = vmax.xlane.f32.xlu1 %v189_v9  ;;  %v308_v18 = vmax.f32 %v306_v11, %v307_v14 }
 0x379   :  { %v309_v22 = vrot.slane %v308_v18, 2 }
 0x37b   :  { %v310_v29 = vmax.f32 %v308_v18, %v309_v22 }
 0x37d   :  { %v311_v36 = vrot.slane %v310_v29, 1 }
 0x37f   :  { %v312_v39 = vmax.f32 %v310_v29, %v311_v36 }
 0x3e2   :  { %v273_v16 = vpop.xlane.xlu1 %272 }
 0x3e3   :  { %v274_v19 = vcvt.f32.s32 %v273_v16 }
 0x3e5   :  { %v277_v20 = vadd.s32 %v276_v17, %v274_v19 }
 0x3e7   :  { %v278_v23 = vrot.slane %v277_v20, 4 }
 0x3e9   :  { %vm279_vm4 = vcmp.lt.s32.totalorder %v277_v20, %v278_v23 }
 0x3ea   :  { %v191_v24 = vpop.xlane.xlu1 %190  ;;  %v280_v25 = vsel %vm279_vm4, %v277_v20, %v278_v23 }
 0x3eb   :  { %v197_v27 = vsub.f32 %v177_v8, %v191_v24  ;;  %v281_v28 = vrot.slane %v280_v25, 2 }
 0x3ed   :  { %v203_v30 = vmul.f32 1.442695, %v197_v27  ;;  %vm282_vm5 = vcmp.lt.s32.totalorder %v280_v25, %v281_v28 }
 0x3ee   :  { %v283_v33 = vsel %vm282_vm5, %v280_v25, %v281_v28 }
 0x3ef   :  { %568 = vpow2.f32 %v203_v30  ;;  %v284_v35 = vrot.slane %v283_v33, 1 }
 0x3f1   :  { %vm285_vm6 = vcmp.lt.s32.totalorder %v283_v33, %v284_v35 }
 0x3f2   :  { %v286_v37 = vsel %vm285_vm6, %v283_v33, %v284_v35  ;;  %vm455_vm6 = vcmp.eq.s32.totalorder %v727_v32, 1 }
 0x3f3   :  { %533 = vpush %v286_v37 }
 0x3f4   :  { %535 = vpush %v301_v38 }
 0x3f5   :  { %v569_v40 = vpop.eup %568  ;;  %537 = vpush %v312_v39 }
 0x3f6   :  { %v213_v42 = vsel %vm182_vm0, %v569_v40, 0.0 }
 0x3f7   :  { %214 = vadd.xlane.f32.xlu2 %v213_v42 }
 0x424   :  { %s755_s6 = spop %533 }
 0x425   :  { %s757_s7 = spop %535  ;;  %p288_p0 = scmp.lt.s32.totalorder %s755_s6, 8 }
 0x426   :  { %s538_s8 = spop %537  ;;  %s303_s10 = sadd.f32 %s757_s7, %s744_s2 }
 0x427   :  { %v314_v43 = vstv %s538_s8  ;;  %s289_s9 = scalar_select %p288_p0, 1, 0 }
 0x428   :  { %vm315_vm7 = vcmp.eq.f32.partialorder %v735_v41, %v314_v43  ;;  %s468_s2 = sshll.u32 %s810_s4, 4  ;;  %s469_s2 = int_to_ptr.hbm [resolvable:$true] %s468_s2 }
 0x429   :  { %v316_v44 = vsel %vm315_vm7, %v747_v61, 64  ;;  %s290_s16 = scvt.s32.f32 %s289_s9  ;;  %vm454_vm7 = vcmp.eq.s32.totalorder %v727_v32, 0 }
 0x42a   :  { %v317_v45 = vsel %vm182_vm0, %v316_v44, 2147483647 }
 0x42b   :  { %v319_v46 = vshra.s32 %v317_v45, 16  ;;  %v318_v54 = vand.u32 65535, %v317_v45 }
 0x42d   :  { %v321_v47 = vcvt.s32.f32 %v319_v46  ;;  %v320_v56 = vcvt.s32.f32 %v318_v54 }
 0x42f   :  { %322 = vmin.xlane.f32.xlu0 %v321_v47 }
 0x46a   :  { %v215_v48 = vpop.xlane.xlu2 %214 }
 0x46b   :  { %570 = vlog2.f32 %v215_v48 }
 0x471   :  { %v571_v49 = vpop.eup %570 }
 0x472   :  { %v224_v50 = vmul.f32 0.6931472, %v571_v49 }
 0x474   :  { %v762_v51 = vsub.f32 %v197_v27, %v224_v50 }
 0x476   :  { %v358_v52 = vsel %vm182_vm0, %v762_v51, -inf  ;;  %v346_v41 = vsel %vm235_vm1, %v762_v51, 0.0 }
 0x477   :  { %359 = vmax.xlane.f32.xlu0 %v358_v52  ;;  %v347_v53 = vsel %vm182_vm0, %v346_v41, 0.0 }
 0x478   :  { %348 = vadd.xlane.f32.xlu2 %v347_v53 }
 0x4a2   :  { %v323_v55 = vpop.xlane.xlu0 %322 }
 0x4a3   :  { %vm324_vm8 = vcmp.eq.f32.partialorder %v321_v47, %v323_v55  ;;  %v329_v0 = vcvt.f32.s32 %v323_v55 }
 0x4a4   :  { %v325_v57 = vsel %vm324_vm8, %v320_v56, inf }
 0x4a5   :  { %326 = vmin.xlane.f32.xlu1 %v325_v57  ;;  %v330_v4 = vshll.u32 %v329_v0, 16 }
 0x4ad   :  { %193 = vmax.xlane.f32.xlu1 %v192_v59 }
 0x4ea   :  { %v360_v62 = vpop.xlane.xlu0 %359 }
 0x4eb   :  { %v349_v60 = vpop.xlane.xlu2 %348  ;;  %v361_v1 = vrot.slane %v360_v62, 4 }
 0x4ec   :  { %v350_v63 = vrot.slane %v349_v60, 4 }
 0x4ed   :  { %v362_v5 = vmax.f32 %v360_v62, %v361_v1 }
 0x4ee   :  { %v351_v2 = vadd.f32 %v350_v63, %v349_v60 }
 0x4ef   :  { %v363_v9 = vrot.slane %v362_v5, 2 }
 0x4f0   :  { %v352_v8 = vrot.slane %v351_v2, 2 }
 0x4f1   :  { %v364_v16 = vmax.f32 %v362_v5, %v363_v9 }
 0x4f2   :  { %v353_v13 = vadd.f32 %v352_v8, %v351_v2 }
 0x4f3   :  { %v365_v21 = vrot.slane %v364_v16, 1 }
 0x4f4   :  { %v354_v19 = vrot.slane %v353_v13, 1 }
 0x4f5   :  { %v366_v24 = vmax.f32 %v364_v16, %v365_v21 }
 0x4f6   :  { %v355_v23 = vadd.f32 %v354_v19, %v353_v13 }
 0x518   :  { %v327_v3 = vpop.xlane.xlu1 %326 }
 0x519   :  { %v328_v6 = vcvt.f32.s32 %v327_v3 }
 0x51b   :  { %v331_v7 = vadd.s32 %v330_v4, %v328_v6 }
 0x51d   :  { %v332_v10 = vrot.slane %v331_v7, 4 }
 0x51f   :  { %vm333_vm9 = vcmp.lt.s32.totalorder %v331_v7, %v332_v10 }
 0x520   :  { %v194_v11 = vpop.xlane.xlu1 %193  ;;  %v334_v12 = vsel %vm333_vm9, %v331_v7, %v332_v10 }
 0x521   :  { %v198_v14 = vsub.f32 %v179_v58, %v194_v11  ;;  %v335_v15 = vrot.slane %v334_v12, 2 }
 0x523   :  { %v205_v17 = vmul.f32 1.442695, %v198_v14  ;;  %vm336_vm10 = vcmp.lt.s32.totalorder %v334_v12, %v335_v15 }
 0x524   :  { %v337_v18 = vsel %vm336_vm10, %v334_v12, %v335_v15 }
 0x525   :  { %572 = vpow2.f32 %v205_v17  ;;  %v338_v20 = vrot.slane %v337_v18, 1 }
 0x527   :  { %vm339_vm11 = vcmp.lt.s32.totalorder %v337_v18, %v338_v20 }
 0x528   :  { %v340_v22 = vsel %vm339_vm11, %v337_v18, %v338_v20 }
 0x529   :  { %539 = vpush %v340_v22 }
 0x52a   :  { %541 = vpush %v355_v23 }
 0x52b   :  { %v573_v25 = vpop.eup %572  ;;  %543 = vpush %v366_v24 }
 0x52c   :  { %v216_v26 = vsel %vm182_vm0, %v573_v25, 0.0 }
 0x52d   :  { %217 = vadd.xlane.f32.xlu2 %v216_v26 }
 0x55a   :  { %s540_s11 = spop %539 }
 0x55b   :  { %p342_p1 = scmp.lt.s32.totalorder %s540_s11, 8  ;;  %s542_s12 = spop %541 }
 0x55c   :  { %s776_s13 = sadd.f32 %s542_s12, %s303_s10  ;;  %s544_s14 = spop %543 }
 0x55d   :  { %s343_s15 = scalar_select %p342_p1, 1, 0  ;;  %v368_v27 = vstv %s544_s14 }
 0x55e   :  { %vm369_vm12 = vcmp.eq.f32.partialorder %v762_v51, %v368_v27 }
 0x55f   :  { %s344_s17 = scvt.s32.f32 %s343_s15  ;;  %v370_v28 = vsel %vm369_vm12, %v747_v61, 64 }
 0x560   :  { %v371_v29 = vsel %vm182_vm0, %v370_v28, 2147483647 }
 0x561   :  { %s781_s18 = sadd.f32 %s344_s17, %s290_s16  ;;  %v373_v30 = vshra.s32 %v371_v29, 16  ;;  %v372_v42 = vand.u32 65535, %v371_v29 }
 0x563   :  { %v375_v33 = vcvt.s32.f32 %v373_v30  ;;  %v374_v44 = vcvt.s32.f32 %v372_v42 }
 0x565   :  { %376 = vmin.xlane.f32.xlu0 %v375_v33 }
 0x5a0   :  { %v218_v34 = vpop.xlane.xlu2 %217 }
 0x5a1   :  { %574 = vlog2.f32 %v218_v34 }
 0x5a7   :  { %v575_v35 = vpop.eup %574 }
 0x5a8   :  { %v226_v36 = vmul.f32 0.6931472, %v575_v35 }
 0x5aa   :  { %v230_v37 = vsub.f32 %v198_v14, %v226_v36 }
 0x5ac   :  { %v412_v38 = vsel %vm182_vm0, %v230_v37, -inf  ;;  %v400_v39 = vsel %vm235_vm1, %v230_v37, 0.0 }
 0x5ad   :  { %413 = vmax.xlane.f32.xlu0 %v412_v38  ;;  %v401_v40 = vsel %vm182_vm0, %v400_v39, 0.0 }
 0x5ae   :  { %402 = vadd.xlane.f32.xlu2 %v401_v40 }
 0x5d8   :  { %v377_v43 = vpop.xlane.xlu0 %376 }
 0x5d9   :  { %vm378_vm13 = vcmp.eq.f32.partialorder %v375_v33, %v377_v43  ;;  %v383_v49 = vcvt.f32.s32 %v377_v43 }
 0x5da   :  { %v379_v45 = vsel %vm378_vm13, %v374_v44, inf }
 0x5db   :  { %380 = vmin.xlane.f32.xlu1 %v379_v45  ;;  %v384_v41 = vshll.u32 %v383_v49, 16 }
 0x620   :  { %v414_v47 = vpop.xlane.xlu0 %413 }
 0x621   :  { %v403_v46 = vpop.xlane.xlu2 %402  ;;  %v415_v50 = vrot.slane %v414_v47, 4 }
 0x622   :  { %v404_v48 = vrot.slane %v403_v46, 4 }
 0x623   :  { %v416_v31 = vmax.f32 %v414_v47, %v415_v50 }
 0x624   :  { %v405_v51 = vadd.f32 %v404_v48, %v403_v46 }
 0x625   :  { %v417_v56 = vrot.slane %v416_v31, 2 }
 0x626   :  { %v406_v55 = vrot.slane %v405_v51, 2 }
 0x627   :  { %v418_v60 = vmax.f32 %v416_v31, %v417_v56 }
 0x628   :  { %v407_v59 = vadd.f32 %v406_v55, %v405_v51 }
 0x629   :  { %v419_v2 = vrot.slane %v418_v60, 1 }
 0x62a   :  { %v408_v0 = vrot.slane %v407_v59, 1 }
 0x62b   :  { %v420_v5 = vmax.f32 %v418_v60, %v419_v2 }
 0x62c   :  { %v409_v4 = vadd.f32 %v408_v0, %v407_v59 }
 0x64e   :  { %v381_v52 = vpop.xlane.xlu1 %380 }
 0x64f   :  { %v382_v53 = vcvt.f32.s32 %v381_v52 }
 0x651   :  { %v385_v54 = vadd.s32 %v384_v41, %v382_v53 }
 0x653   :  { %v386_v57 = vrot.slane %v385_v54, 4 }
 0x655   :  { %vm387_vm14 = vcmp.lt.s32.totalorder %v385_v54, %v386_v57 }
 0x656   :  { %v388_v58 = vsel %vm387_vm14, %v385_v54, %v386_v57 }
 0x657   :  { %v389_v62 = vrot.slane %v388_v58, 2 }
 0x659   :  { %vm390_vm15 = vcmp.lt.s32.totalorder %v388_v58, %v389_v62 }
 0x65a   :  { %v391_v63 = vsel %vm390_vm15, %v388_v58, %v389_v62 }
 0x65b   :  { %v392_v1 = vrot.slane %v391_v63, 1 }
 0x65d   :  { %vm393_vm1 = vcmp.lt.s32.totalorder %v391_v63, %v392_v1 }
 0x65e   :  { %v394_v3 = vsel %vm393_vm1, %v391_v63, %v392_v1 }
 0x65f   :  { %545 = vpush %v394_v3 }
 0x660   :  { %547 = vpush %v409_v4 }
 0x661   :  { %549 = vpush %v420_v5 }
 0x690   :  { %s546_s19 = spop %545 }
 0x691   :  { %p396_p2 = scmp.lt.s32.totalorder %s546_s19, 8  ;;  %s788_s20 = spop %547 }
 0x692   :  { %s411_s21 = sadd.f32 %s788_s20, %s776_s13  ;;  %s550_s22 = spop %549 }
 0x693   :  { %s397_s23 = scalar_select %p396_p2, 1, 0  ;;  %v422_v6 = vstv %s550_s22 }
 0x694   :  { %vm423_vm2 = vcmp.eq.f32.partialorder %v230_v37, %v422_v6  ;;  %v458_v26 = vstv %s411_s21 }
 0x695   :  { %s398_s24 = scvt.s32.f32 %s397_s23  ;;  %v424_v7 = vsel %vm423_vm2, %v747_v61, 64 }
 0x696   :  { %v425_v8 = vsel %vm182_vm0, %v424_v7, 2147483647 }
 0x697   :  { %s795_s25 = sadd.f32 %s398_s24, %s781_s18  ;;  %v427_v9 = vshra.s32 %v425_v8, 16  ;;  %v426_v11 = vand.u32 65535, %v425_v8 }
 0x699   :  { %v429_v10 = vcvt.s32.f32 %v427_v9  ;;  %v428_v13 = vcvt.s32.f32 %v426_v11 }
 0x69b   :  { %430 = vmin.xlane.f32.xlu1 %v429_v10 }
 0x70e   :  { %v431_v12 = vpop.xlane.xlu1 %430 }
 0x70f   :  { %vm432_vm3 = vcmp.eq.f32.partialorder %v429_v10, %v431_v12  ;;  %v437_v15 = vcvt.f32.s32 %v431_v12 }
 0x710   :  { %v433_v14 = vsel %vm432_vm3, %v428_v13, inf }
 0x711   :  { %434 = vmin.xlane.f32.xlu2 %v433_v14  ;;  %v438_v17 = vshll.u32 %v437_v15, 16 }
 0x784   :  { %v435_v16 = vpop.xlane.xlu2 %434 }
 0x785   :  { %v436_v18 = vcvt.f32.s32 %v435_v16 }
 0x787   :  { %v439_v19 = vadd.s32 %v438_v17, %v436_v18 }
 0x789   :  { %v440_v20 = vrot.slane %v439_v19, 4 }
 0x78b   :  { %vm441_vm4 = vcmp.lt.s32.totalorder %v439_v19, %v440_v20 }
 0x78c   :  { %v442_v61 = vsel %vm441_vm4, %v439_v19, %v440_v20 }
 0x78d   :  { %v443_v21 = vrot.slane %v442_v61, 2 }
 0x78f   :  { %vm444_vm0 = vcmp.lt.s32.totalorder %v442_v61, %v443_v21 }
 0x790   :  { %v445_v22 = vsel %vm444_vm0, %v442_v61, %v443_v21 }
 0x791   :  { %v446_v23 = vrot.slane %v445_v22, 1 }
 0x793   :  { %vm447_vm5 = vcmp.lt.s32.totalorder %v445_v22, %v446_v23 }
 0x794   :  { %v448_v24 = vsel %vm447_vm5, %v445_v22, %v446_v23 }
 0x795   :  { %551 = vpush %v448_v24 }
 0x7c6   :  { %s552_s26 = spop %551 }
 0x7c7   :  { %p450_p3 = scmp.lt.s32.totalorder %s552_s26, 8 }
 0x7c9   :  { %s451_s27 = scalar_select %p450_p3, 1, 0 }
 0x7cb   :  { %s452_s28 = scvt.s32.f32 %s451_s27 }
 0x7cd   :  { %s453_s30 = sadd.f32 %s452_s28, %s795_s25 }
 0x7cf   :  { %v456_v25 = vstv %s453_s30 }
 0x7d0   :  { %v457_v27 = vsel %vm455_vm6, %v456_v25, 0.0 }
 0x7d1   :  { %v459_v28 = vsel %vm454_vm7, %v458_v26, %v457_v27 }
 0x7d2   :  { %460 = vst [vmem:[#allocation8] sm:$0x1] %v459_v28 }
 0x7d3   :  { %471 = dma.vmem_to_hbm [thread:$0]  %s467_s1, 16, %s469_s2, [#allocation4]  }
 0x7d4   :  { %676 = dma.done.wait [#allocation4], 16  }
 0x7d5   :  { %677 = vsyncadd [#allocation4], 4294967280 }
 0x7d6   :  { %476 = vsyncpa [#allocation3], 1 }
 0x7d7   :  { %477 = vsyncpa [#allocation6], 1 }
 0x7d8   :  { %478 = vsyncpa [#allocation4], 1 }

</bundles_post_ra>
